<compile_context>
chip_gen: v5e
topology: v5e:2x2
jax: 0.10.0
libtpu: 0.0.40
codegen_flags: <defaults>
</compile_context>

<pallas_src>
import jax
import jax.numpy as jnp
from jax.experimental import pallas as pl
from jax.experimental.pallas import tpu as pltpu


def _vmem_limit_bytes(default=64 * 1024 * 1024):
    """~75% of physical VMEM: ~96 MiB on v5e/v6e (128 MiB), ~48 MiB on v7x (64 MiB)."""
    try:
        info = pltpu.get_tpu_info()
        cap = getattr(info, "vmem_capacity_bytes", None)
        if not cap:
            return default
        return int(min(cap - cap // 4, 112 * 1024 * 1024))
    except Exception:
        return default


# ---------------------------------------------------------------------------
# Kernel 1: ConvTranspose2d(din, dout, kernel_size=2, stride=2, padding=0)
#   up[n, 2i+kh, 2j+kw, co] = sum_ci x[n,i,j,ci] * W[ci,co,kh,kw] + b[co]
# stride == kernel_size -> no tap overlap, so each kh slab is one matmul
#   (tr*W, din) @ (din, 2*dout) with lanes = (kw, co).  The output array is laid out as
#   (N*H, 2, W, 2*dout), whose row-major order equals NHWC of the 2x-upsampled image,
#   so no post-kernel transpose/interleave pass over HBM is needed (free reshape).
# ---------------------------------------------------------------------------
def _upconv_rows_kernel(x_ref, w_ref, b_ref, o_ref):
    # x_ref: (tr*W, din)     tr input rows of W pixels, flattened on the M dim
    # w_ref: (din, 2*dout)   the (kw, co) weight slab of one kh
    # b_ref: (1, 2*dout)
    # o_ref: (tr, W, 2*dout) output rows 2*i + kh, lanes = (kw, co)
    tr, W, twod = o_ref.shape
    y = jnp.dot(x_ref[...], w_ref[...], preferred_element_type=jnp.float32) + b_ref[...]
    o_ref[...] = y.reshape(tr, W, twod)


def _pick_rows_per_step(rows_total, W, target_rows=1024):
    tr = max(1, min(target_rows // max(W, 1), rows_total))
    if rows_total >= 2:
        tr = max(1, min(tr, rows_total // 2))       # keep >= 2 grid steps (v7x megacore)
    if tr < rows_total and (tr * W) % 8 != 0:       # sublane-align the 2-D x block
        t = tr
        while t > 1 and (t * W) % 8 != 0:
            t -= 1
        tr = t if (t * W) % 8 == 0 else rows_total
    return tr


def upconv2x(x_nhwc, wt, bt):
    """ConvTranspose2d(din, dout, k=2, s=2).  wt: (din, dout, 2, 2) (PyTorch layout)."""
    N, H, W, din = x_nhwc.shape
    dout = wt.shape[1]
    # w2[kh, ci, kw*dout + co] = wt[ci, co, kh, kw]
    w2 = jnp.transpose(wt, (2, 0, 3, 1)).reshape(2, din, 2 * dout).astype(jnp.float32)
    b2 = jnp.tile(bt, 2)[None, :].astype(jnp.float32)            # (1, 2*dout)
    rows = N * H
    x2d = x_nhwc.reshape(rows * W, din)                          # free reshape
    tr = _pick_rows_per_step(rows, W)
    grid_m = pl.cdiv(rows, tr)
    cost = pl.CostEstimate(
        flops=2 * rows * W * din * 4 * dout,
        transcendentals=0,
        bytes_accessed=4 * (rows * W * din + 2 * din * 2 * dout + rows * W * 4 * dout),
    )
    up4 = pl.pallas_call(
        _upconv_rows_kernel,
        out_shape=jax.ShapeDtypeStruct((rows, 2, W, 2 * dout), jnp.float32),
        grid=(grid_m, 2),     # kh innermost: the x block is reused (not re-DMA'd) across kh
        in_specs=[
            pl.BlockSpec((tr * W, din), lambda m, kh: (m, 0)),
            pl.BlockSpec((None, din, 2 * dout), lambda m, kh: (kh, 0, 0)),
            pl.BlockSpec((1, 2 * dout), lambda m, kh: (0, 0)),
        ],
        out_specs=pl.BlockSpec((tr, None, W, 2 * dout), lambda m, kh: (m, kh, 0, 0)),
        compiler_params=pltpu.CompilerParams(
            dimension_semantics=("parallel", "arbitrary"),
            vmem_limit_bytes=_vmem_limit_bytes()),
        cost_estimate=cost,
    )(x2d, w2, b2)
    # (N*H, 2, W, 2*dout) row-major == NHWC of the upsampled image -> free reshape, no transpose.
    return up4.reshape(N, 2 * H, 2 * W, dout)


# ---------------------------------------------------------------------------
# Kernel 2: Conv2d(c_up + c_y, dout, k=3, s=1, p=0) + BatchNorm2d(eval) + ReLU, fused.
# The channel concat of `up` and the lateral `y` never hits HBM: the weights are split into
# two slabs and each 3x3 tap is two dots.  Grid = (batch, output-row band).  The band's two
# extra input rows come from two 1-row clamped halo views; inside the kernel the body+halo
# rows form one (tr+2, Wc, C) slab and the conv is 18 dots of shape (tr*Wo, C) @ (C, dout).
# TODO(synk): training-mode BatchNorm (batch statistics + running-stat update) has no clean
# single-kernel equivalent here; eval-mode affine BN is fused instead.
# ---------------------------------------------------------------------------
def _dual_conv3x3_bn_relu_kernel(ub_ref, uh0_ref, uh1_ref, yb_ref, yh0_ref, yh1_ref,
                                 wu_ref, wy_ref, scale_ref, shift_ref, o_ref):
    # ub/yb   : (TR, Wc, C)  body rows [b*TR, b*TR + TR)
    # uh*/yh* : (1,  Wc, C)  halo rows b*TR + TR and b*TR + TR + 1 (clamped, see wrapper)
    # wu/wy   : (9, C, dout) 3x3 taps (dy*3 + dx), split by source (up / lateral y)
    # scale/shift : (1, dout) folded conv-bias + eval-mode BatchNorm affine
    # o_ref   : (TR, Wo, dout) one band of output rows
    TR, Wo, dout = o_ref.shape
    MM = TR * Wo
    u_slab = jnp.concatenate([ub_ref[...], uh0_ref[...], uh1_ref[...]], axis=0)
    y_slab = jnp.concatenate([yb_ref[...], yh0_ref[...], yh1_ref[...]], axis=0)
    acc = jnp.zeros((MM, dout), jnp.float32)
    for dy in range(3):
        for dx in range(3):
            t = dy * 3 + dx
            xu = u_slab[dy:dy + TR, dx:dx + Wo, :].reshape(MM, u_slab.shape[-1])
            xy = y_slab[dy:dy + TR, dx:dx + Wo, :].reshape(MM, y_slab.shape[-1])
            acc = acc + jnp.dot(xu, wu_ref[t], preferred_element_type=jnp.float32)
            acc = acc + jnp.dot(xy, wy_ref[t], preferred_element_type=jnp.float32)
    out = jnp.maximum(acc * scale_ref[...] + shift_ref[...], 0.0)
    o_ref[...] = out.reshape(TR, Wo, dout)


def dual_conv3x3_bn_relu(up_c, y_c, wc, bc, gamma, beta, running_mean, running_var,
                         *, eps=1e-5, tr_max=32):
    """Conv2d over cat([up_c, y_c], channels), 3x3 valid -> BN(eval) -> ReLU, without
    materializing the concat.  wc: (dout, c_up + c_y, 3, 3) (PyTorch layout)."""
    N, Hc, Wc, c_up = up_c.shape
    Ny, Hy, Wy, c_y = y_c.shape
    assert (N, Hc, Wc) == (Ny, Hy, Wy), "up / lateral spatial shapes must match after crop"
    dout = wc.shape[0]
    assert wc.shape[1] == c_up + c_y
    Ho, Wo = Hc - 2, Wc - 2

    # Band height: bounded by tr_max and by an accumulator budget; keep >= 2 bands when N == 1.
    tr = max(1, min(tr_max, Ho))
    acc_budget = 2 * 1024 * 1024
    tr = max(1, min(tr, acc_budget // max(1, Wo * dout * 4)))
    if N == 1 and Ho >= 2:
        tr = min(tr, max(1, -(-Ho // 2)))   # at least 2 bands for v7x megacore
    grid_b = pl.cdiv(Ho, tr)

    w_hwio = jnp.transpose(wc, (2, 3, 1, 0)).astype(jnp.float32)   # (3, 3, Cin, dout)
    w_up9 = w_hwio[:, :, :c_up, :].reshape(9, c_up, dout)          # up slab
    w_y9 = w_hwio[:, :, c_up:, :].reshape(9, c_y, dout)            # lateral slab
    scale = (gamma / jnp.sqrt(running_var + eps)).astype(jnp.float32)
    shift = (beta + (bc - running_mean) * scale).astype(jnp.float32)
    scale2d = scale[None, :]
    shift2d = shift[None, :]

    def body_map(n, b):
        return (n, b, 0, 0)

    # Halo rows b*tr + tr and b*tr + tr + 1.  The clamp only activates on the (masked)
    # partial last band: whenever a halo row feeds a valid output row it is in-bounds.
    def halo0_map(n, b):
        return (n, jnp.minimum(b * tr + tr, Hc - 1), 0, 0)

    def halo1_map(n, b):
        return (n, jnp.minimum(b * tr + tr + 1, Hc - 1), 0, 0)

    cost = pl.CostEstimate(
        flops=2 * 9 * N * Ho * Wo * (c_up + c_y) * dout,
        transcendentals=0,
        bytes_accessed=4 * (N * Hc * Wc * (c_up + c_y) + N * Ho * Wo * dout
                            + 9 * (c_up + c_y) * dout + 2 * dout),
    )
    return pl.pallas_call(
        _dual_conv3x3_bn_relu_kernel,
        out_shape=jax.ShapeDtypeStruct((N, Ho, Wo, dout), jnp.float32),
        grid=(N, grid_b),
        in_specs=[
            pl.BlockSpec((None, tr, Wc, c_up), body_map),
            pl.BlockSpec((None, 1, Wc, c_up), halo0_map),
            pl.BlockSpec((None, 1, Wc, c_up), halo1_map),
            pl.BlockSpec((None, tr, Wc, c_y), body_map),
            pl.BlockSpec((None, 1, Wc, c_y), halo0_map),
            pl.BlockSpec((None, 1, Wc, c_y), halo1_map),
            pl.BlockSpec((9, c_up, dout), lambda n, b: (0, 0, 0)),
            pl.BlockSpec((9, c_y, dout), lambda n, b: (0, 0, 0)),
            pl.BlockSpec((1, dout), lambda n, b: (0, 0)),
            pl.BlockSpec((1, dout), lambda n, b: (0, 0)),
        ],
        out_specs=pl.BlockSpec((None, tr, Wo, dout), body_map),
        compiler_params=pltpu.CompilerParams(
            dimension_semantics=("parallel", "parallel"),
            vmem_limit_bytes=_vmem_limit_bytes()),
        cost_estimate=cost,
    )(up_c, up_c, up_c, y_c, y_c, y_c, w_up9, w_y9, scale2d, shift2d)


# ---------------------------------------------------------------------------
# Glue: crop (faithful NHWC port of UpConv.crop), forward, params, reference.
# ---------------------------------------------------------------------------
def crop_nhwc(x, y):
    # As in the PyTorch module, the crop amount is derived from the width axis and
    # applied to both spatial axes.
    wx, wy = x.shape[2], y.shape[2]
    if wx == wy:
        return x, y
    if wx > wy:
        low = (wx - wy) // 2
        high = wx - wy - low
        return x[:, low:-high, low:-high, :], y
    low = (wy - wx) // 2
    high = wy - wx - low
    return x, y[:, low:-high, low:-high, :]


def upconv_forward(params, x_nchw, y_nchw):
    # TODO(synk): in a full UNet keep activations NHWC end-to-end and drop these transposes.
    x = jnp.transpose(x_nchw, (0, 2, 3, 1))
    y = jnp.transpose(y_nchw, (0, 2, 3, 1))
    up = upconv2x(x, params["wt"], params["bt"])
    up, y = crop_nhwc(up, y)
    # torch.cat([up, y], dim=1) is folded into the conv kernel (no HBM concat).
    out = dual_conv3x3_bn_relu(up, y, params["wc"], params["bc"], params["gamma"],
                               params["beta"], params["running_mean"],
                               params["running_var"])
    return jnp.transpose(out, (0, 3, 1, 2))                # back to NCHW


def upconv_forward_ref(params, x_nchw, y_nchw):
    x = jnp.transpose(x_nchw, (0, 2, 3, 1))
    y = jnp.transpose(y_nchw, (0, 2, 3, 1))
    N, H, W, _ = x.shape
    wt, bt = params["wt"], params["bt"]
    dout = wt.shape[1]
    up = jnp.einsum("nhwc,cokl->nhkwlo", x, wt).reshape(N, 2 * H, 2 * W, dout) + bt
    up, y = crop_nhwc(up, y)
    z = jnp.concatenate([up, y], axis=-1)
    w_hwio = jnp.transpose(params["wc"], (2, 3, 1, 0))
    conv = jax.lax.conv_general_dilated(
        z, w_hwio, window_strides=(1, 1), padding="VALID",
        dimension_numbers=("NHWC", "HWIO", "NHWC")) + params["bc"]
    eps = 1e-5
    scale = params["gamma"] / jnp.sqrt(params["running_var"] + eps)
    out = jnp.maximum((conv - params["running_mean"]) * scale + params["beta"], 0.0)
    return jnp.transpose(out, (0, 3, 1, 2))


def init_params(key, din, d_horizontal, dout):
    ks = jax.random.split(key, 8)
    cin = d_horizontal + dout
    return {
        "wt": 0.1 * jax.random.normal(ks[0], (din, dout, 2, 2), jnp.float32),
        "bt": 0.1 * jax.random.normal(ks[1], (dout,), jnp.float32),
        "wc": 0.1 * jax.random.normal(ks[2], (dout, cin, 3, 3), jnp.float32),
        "bc": 0.1 * jax.random.normal(ks[3], (dout,), jnp.float32),
        "gamma": 1.0 + 0.1 * jax.random.normal(ks[4], (dout,), jnp.float32),
        "beta": 0.1 * jax.random.normal(ks[5], (dout,), jnp.float32),
        "running_mean": 0.1 * jax.random.normal(ks[6], (dout,), jnp.float32),
        "running_var": jnp.abs(jax.random.normal(ks[7], (dout,), jnp.float32)) + 0.5,
    }


if __name__ == "__main__":
    key = jax.random.PRNGKey(0)
    kp, kx, ky = jax.random.split(key, 3)
    N, din, d_h, dout = 2, 8, 4, 16
    H = W = 8              # upconv input -> up is 16x16
    Hy = Wy = 10           # lateral input smaller than up -> exercises the crop-up path
    params = init_params(kp, din, d_h, dout)
    x = jax.random.normal(kx, (N, din, H, W), jnp.float32)       # NCHW
    y = jax.random.normal(ky, (N, d_h, Hy, Wy), jnp.float32)     # NCHW

    out = jax.block_until_ready(upconv_forward(params, x, y))
    ref = jax.block_until_ready(upconv_forward_ref(params, x, y))

    assert out.shape == (N, dout, Wy - 2, Wy - 2), out.shape
    err = float(jnp.max(jnp.abs(out - ref)))
    assert jnp.allclose(out, ref, atol=2e-4, rtol=2e-4), err
    print("KERNEL_OK")
</pallas_src>

<mosaic_0001>
module attributes {stable_mosaic.version = 11 : i64} {
  func.func @_upconv_rows_kernel(%arg0: i32, %arg1: i32, %arg2: memref<64x8xf32, #tpu.memory_space<vmem>>, %arg3: memref<1x8x32xf32, #tpu.memory_space<vmem>>, %arg4: memref<1x32xf32, #tpu.memory_space<vmem>>, %arg5: memref<8x1x8x32xf32, #tpu.memory_space<vmem>>) attributes {dimension_semantics = [#tpu.dimension_semantics<parallel>, #tpu.dimension_semantics<arbitrary>], iteration_bounds = array<i64: 2, 2>, scalar_prefetch = 0 : i64, scratch_operands = 0 : i64, tpu.core_type = #tpu.core_type<tc>, window_params = [{transform_indices = @transform_0, window_bounds = array<i64: 64, 8>}, {transform_indices = @transform_1, window_bounds = array<i64: 1, 8, 32>}, {pipeline_mode = #tpu.pipeline_mode<synchronous>, transform_indices = @transform_2, window_bounds = array<i64: 1, 32>}, {transform_indices = @transform_3, window_bounds = array<i64: 8, 1, 8, 32>}]} {
    %c0 = arith.constant 0 : index
    %c0_0 = arith.constant 0 : index
    %0 = vector.load %arg2[%c0, %c0_0] : memref<64x8xf32, #tpu.memory_space<vmem>>, vector<64x8xf32>
    %c0_1 = arith.constant 0 : index
    %c0_2 = arith.constant 0 : index
    %c0_3 = arith.constant 0 : index
    %1 = vector.load %arg3[%c0_1, %c0_2, %c0_3] : memref<1x8x32xf32, #tpu.memory_space<vmem>>, vector<1x8x32xf32>
    %2 = vector.shape_cast %1 : vector<1x8x32xf32> to vector<8x32xf32>
    %cst = arith.constant dense<0.000000e+00> : vector<64x32xf32>
    %3 = tpu.matmul %0, %2, %cst {dimension_numbers = #tpu.dot_dimension_numbers<[1], [0], [0], [1], [0, 0, 1, 1], [], []>} : vector<64x8xf32>, vector<8x32xf32>, vector<64x32xf32> -> vector<64x32xf32>
    %c0_4 = arith.constant 0 : index
    %c0_5 = arith.constant 0 : index
    %4 = vector.load %arg4[%c0_4, %c0_5] : memref<1x32xf32, #tpu.memory_space<vmem>>, vector<1x32xf32>
    %5 = vector.broadcast %4 : vector<1x32xf32> to vector<64x32xf32>
    %6 = arith.addf %3, %5 : vector<64x32xf32>
    %7 = vector.shape_cast %6 : vector<64x32xf32> to vector<8x8x32xf32>
    %c0_6 = arith.constant 0 : index
    %c0_7 = arith.constant 0 : index
    %c0_8 = arith.constant 0 : index
    %c0_9 = arith.constant 0 : index
    %8 = vector.load %arg5[%c0_6, %c0_7, %c0_8, %c0_9] : memref<8x1x8x32xf32, #tpu.memory_space<vmem>>, vector<8x1x8x32xf32>
    %9 = vector.shape_cast %8 : vector<8x1x8x32xf32> to vector<8x8x32xf32>
    %10 = vector.shape_cast %7 : vector<8x8x32xf32> to vector<8x1x8x32xf32>
    tpu.vector_store %arg5[%c0_6, %c0_7, %c0_8, %c0_9], %10 {strides = array<i32>} : memref<8x1x8x32xf32, #tpu.memory_space<vmem>>, vector<8x1x8x32xf32>,
    return
  }
  func.func @transform_0(%arg0: i32, %arg1: i32) -> (i32, i32) {
    %c0_i32 = arith.constant 0 : i32
    %c0_i32_0 = arith.constant 0 : i32
    return %arg0, %c0_i32 : i32, i32
  }
  func.func @transform_1(%arg0: i32, %arg1: i32) -> (i32, i32, i32) {
    %c0_i32 = arith.constant 0 : i32
    %c0_i32_0 = arith.constant 0 : i32
    %c0_i32_1 = arith.constant 0 : i32
    return %arg1, %c0_i32, %c0_i32_0 : i32, i32, i32
  }
  func.func @transform_2(%arg0: i32, %arg1: i32) -> (i32, i32) {
    %c0_i32 = arith.constant 0 : i32
    %c0_i32_0 = arith.constant 0 : i32
    %c0_i32_1 = arith.constant 0 : i32
    return %c0_i32, %c0_i32_0 : i32, i32
  }
  func.func @transform_3(%arg0: i32, %arg1: i32) -> (i32, i32, i32, i32) {
    %c0_i32 = arith.constant 0 : i32
    %c0_i32_0 = arith.constant 0 : i32
    %c0_i32_1 = arith.constant 0 : i32
    return %arg0, %arg1, %c0_i32, %c0_i32_0 : i32, i32, i32, i32
  }
}

</mosaic_0001>

<bundles_post_ra>
// kernel: tpu_custom_call.1
= control target key start
LH: loop header
LB: loop body
LE: loop exit
PB: predicated region body
PF: predicated region fallthrough
CT: control target
= control target key end

     0   :  { %8 = vsyncpa [#allocation3], 0  ;;  %s767_s0 = inlined_call_operand.vmem [shape: f32[128,8], index: 0, kind: input, shape index: {}]   ;;  %s768_s1 = inlined_call_operand.vmem [shape: f32[2,8,32], index: 1, kind: input, shape index: {}]   ;;  %s769_s2 = inlined_call_operand.vmem [shape: f32[1,32], index: 2, kind: input, shape index: {}]   ;;  %s770_s3 = inlined_call_operand.hbm [shape: f32[16,2,8,32], index: 3, kind: output, shape index: {}]  }
   0x1   :  { %10 = vsyncpa [#allocation3 + $0x1], 0  ;;  %s617_s12 = smov 0   ;;  %s619_s13 = smov 0  }
   0x2   :  { %s621_s14 = smov 0   ;;  %s623_s15 = smov 0  }
   0x3   :  { %s625_s16 = smov 0   ;;  %s627_s17 = smov 0  }
   0x4   :  { %s629_s18 = smov 0   ;;  %s631_s19 = smov 0  }
   0x5 LB: > { %s396_s20 = sadd.s32 4294967295, %s592_s19   ;;  %s397_s21 = sadd.s32 4294967294, %s592_s19   ;;  %s592_s19 = sphi %s631_s19, %s16_s19   ;;  %s588_s18 = sphi %s629_s18, %s779_s18   ;;  %s584_s17 = sphi %s627_s17, %s778_s17   ;;  %s580_s16 = sphi %s625_s16, %s777_s16   ;;  %s576_s15 = sphi %s623_s15, %s776_s15   ;;  %s572_s14 = sphi %s621_s14, %s775_s14   ;;  %s568_s13 = sphi %s619_s13, %s774_s13   ;;  %s564_s12 = sphi %s617_s12, %s773_s12  }
   0x6   : > { %s25_s22 = sadd.s32 1, %s584_s17  ;;  %s28_s23 = sadd.s32 1, %s588_s18 }
   0x7   : > { %p26_p0 = scmp.ge.s32.totalorder %s25_s22, 2  ;;  %p120_p1 = scmp.ne.s32.totalorder %s572_s14, %s568_s13 }
   0x8   : > { %p121_p2 = scmp.eq.s32.totalorder %s396_s20, 3  ;;  %p126_p5 = scmp.ne.s32.totalorder %s568_s13, %s564_s12 }
   0x9   : > { %s781_s22 = smov (%p26_p0, %s25_s22), 0  ;;  %s783_s23 = smov (!%p26_p0, %s28_s23), %s588_s18 }
   0xa   : > { %s106_s24 = ssub.s32 %s584_s17, %s781_s22  ;;  %p668_p3 = por %p121_p2, %p120_p1 }
   0xb   : > { %p30_p4 = scmp.ge.s32.totalorder %s783_s23, 2  ;;  %p127_p6 = scmp.eq.s32.totalorder %s397_s21, 3 }
   0xc   : > { %p400_p7 = scmp.ge.s32.totalorder %s592_s19, 1  ;;  %p164_p9 = scmp.lt.s32.totalorder %s592_s19, 5 }
   0xd   : > { %s785_s23 = smov (%p30_p4, %s783_s23), 0  ;;  %p677_p8 = por %p127_p6, %p126_p5 }
   0xe   : > { %s105_s27 = ssub.s32 %s588_s18, %s785_s23  ;;  %s110_s28 = sadd.s32 1, %s572_s14 }
   0xf   : > { %s107_s29 = sor.u32 %s106_s24, %s105_s27  ;;  %p165_p10 = pnand %p400_p7, %p164_p9 }
  0x10   : > { %p108_p11 = scmp.eq.s32.totalorder %s107_s29, 0  ;;  %p198_p12 = scmp.lt.s32.totalorder (!%p165_p10), %s576_s15, 1 }
  0x11   : > { %168 = sbr.rel (%p165_p10) target bundleno = 176 (0xb0), region = 32  ;;  %s402_s4 = sshll.u32 (!%p165_p10), %s580_s16, 3 }
  0x12   : > { %s686_s30 = scalar_select %p108_p11, %s572_s14, %s110_s28  }
  0x13   : > { %p193_p13 = scmp.lt.s32.totalorder (!%p165_p10), %s402_s4, 15  ;;  %s189_s24 = sand.u32 (!%p165_p10), 1, %s568_s13  }
  0x14   : > { %s401_s27 = sshll.u32 (!%p165_p10), %s189_s24, 6  ;;  %s292_s11 = scalar_lea.sflag (!%p165_p10), [#allocation3], %s189_s24 }
  0x15   : > { %s518_s29 = scalar_lea.hbm (!%p165_p10), %s770_s3, 256 }
  0x16   : > { %s199_s5 = scalar_select %p198_p12, %s576_s15, 1  ;;  %vm216_vm0 = vcmask 64512   ;;  %v497_v9 = vld [vmem:[%s769_s2] ss:$0 sm:$0xff]  ;;  %vm282_vm1 = vcmask 261120  }
  0x17   : > { %s787_s4 = smov (!%p193_p13, %s402_s4), 15 }
  0x18   : > { %s404_s6 = sshll.u32 %s199_s5, 3  ;;  %s403_s10 = sshll.u32 %s787_s4, 3 }
  0x19   : > { %s201_s9 = scalar_lea.vmem %s768_s1, %s404_s6  ;;  %s196_s21 = scalar_lea.vmem %s767_s0, %s403_s10 }
  0x1a   : > { %v211_v0 = vld [vmem:[%s201_s9] sm:$0xff]  ;;  %v209_v2 = vld [vmem:[%s196_s21 + $0x30] sm:$0xff]  ;;  %v208_v5 = vld [vmem:[%s196_s21 + $0x28] sm:$0xff]  ;;  %s419_s4 = sshll.u32 %s580_s16, 4  ;;  %s191_s6 = scalar_lea.vmem [#allocation2], %s401_s27 }
  0x1b   : > { %421 = vmatpush.msra.mxu2 %v211_v0  ;;  %422 = vmatpush.msra.mxu3 %v211_v0  ;;  %v207_v1 = vld [vmem:[%s196_s21 + $0x20] sm:$0xff]  ;;  %v205_v4 = vld [vmem:[%s196_s21 + $0x10] sm:$0xff]  ;;  %v210_v6 = vld [vmem:[%s196_s21 + $0x38] sm:$0xff]  ;;  %s303_s5 = sadd.s32 %s576_s15, %s419_s4  ;;  %s306_s15 = sshll.u32 %s191_s6, 4  ;;  %s721_s15 = int_to_ptr.vmem [resolvable:$true] %s306_s15 }
  0x1c   : > { %v203_v3 = vld [vmem:[%s196_s21] sm:$0xff]  ;;  %409 = vmatmul.msk.f32.vlgmr.msra.gmra.mxu2 %vm216_vm0, %v207_v1  ;;  %411 = vmatmul.msk.f32.vlgmr.msra.gmra.mxu3 %vm216_vm0, %v209_v2  ;;  %v204_v7 = vld [vmem:[%s196_s21 + $0x8] sm:$0xff]  ;;  %v206_v8 = vld [vmem:[%s196_s21 + $0x18] sm:$0xff]  ;;  %s416_s7 = sshll.u32 %s303_s5, 3 }
  0x1d   : > { %256 = vmatpush.msra.mxu0 %v211_v0  ;;  %420 = vmatpush.msra.mxu1 %v211_v0  ;;  %s305_s9 = scalar_lea.hbm %s770_s3, %s416_s7 }
  0x1e   : > { %405 = vmatmul.msk.f32.vlgmr.msra.gmra.mxu0 %vm216_vm0, %v203_v3  ;;  %407 = vmatmul.msk.f32.vlgmr.msra.gmra.mxu1 %vm216_vm0, %v205_v4  ;;  %s308_s10 = sshll.u32 %s305_s9, 4  ;;  %s309_s10 = int_to_ptr.hbm [resolvable:$true] %s308_s10 }
  0x1f   : > { %s512_s20 = sshra.s32 %s309_s10, 4  ;;  %s513_s20 = int_to_ptr.hbm [resolvable:$true] %s512_s20 }
  0x20   : > { %s514_s21 = scalar_lea.hbm %s513_s20, 64  ;;  %p519_p4 = scmp.lt.s32.totalorder %s513_s20, %s770_s3 }
  0x21   : > { %p515_p0 = scmp.ne.s32.totalorder %s513_s20, %s514_s21  ;;  %p520_p5 = scmp.lt.s32.totalorder %s518_s29, %s514_s21 }
  0x23   : > { %p516_p1 = pnand %p515_p0, %p668_p3  ;;  %p521_p6 = por %p520_p5, %p519_p4 }
  0x24   : > { %410 = vmatmul.msk.f32.gmra.mxu2 %vm216_vm0, %v208_v5  ;;  %412 = vmatmul.msk.f32.gmra.mxu3 %vm216_vm0, %v210_v6 }
  0x25   : > { %p517_p2 = pneg %p516_p1 }
  0x26   : > { %406 = vmatmul.msk.f32.gmra.mxu0 %vm216_vm0, %v204_v7  ;;  %408 = vmatmul.msk.f32.gmra.mxu1 %vm216_vm0, %v206_v8 }
  0x27   : > { %p522_p7 = pnand %p521_p6, %p517_p2 }
  0x9b   : > { %v258_v10 = vpop.f32.mrf.mxu0  ;;  %v264_v11 = vpop.f32.mrf.mxu1 }
  0x9c   : > { %v259_v12 = vadd.f32 %v497_v9, %v258_v10  ;;  %v265_v13 = vadd.f32 %v497_v9, %v264_v11 }
  0x9e   : > { %283 = vst.msk [vmem:[%s191_s6] sm:$0xff] %vm282_vm1, %v259_v12 }
  0x9f   : > { %285 = vst.msk [vmem:[%s191_s6 + $0x10] sm:$0xff] %vm282_vm1, %v265_v13  ;;  %v270_v14 = vpop.f32.mrf.mxu2  ;;  %v276_v15 = vpop.f32.mrf.mxu3 }
  0xa0   : > { %v271_v16 = vadd.f32 %v497_v9, %v270_v14  ;;  %v277_v17 = vadd.f32 %v497_v9, %v276_v15 }
  0xa2   : > { %287 = vst.msk [vmem:[%s191_s6 + $0x20] sm:$0xff] %vm282_vm1, %v271_v16 }
  0xa3   : > { %289 = vst.msk [vmem:[%s191_s6 + $0x30] sm:$0xff] %vm282_vm1, %v277_v17  ;;  %v261_v18 = vpop.f32.mrf.mxu0  ;;  %v267_v19 = vpop.f32.mrf.mxu1 }
  0xa4   : > { %v262_v20 = vadd.f32 %v497_v9, %v261_v18  ;;  %v268_v21 = vadd.f32 %v497_v9, %v267_v19 }
  0xa6   : > { %284 = vst.msk [vmem:[%s191_s6 + $0x8] sm:$0xff] %vm282_vm1, %v262_v20 }
  0xa7   : > { %286 = vst.msk [vmem:[%s191_s6 + $0x18] sm:$0xff] %vm282_vm1, %v268_v21  ;;  %v273_v22 = vpop.f32.mrf.mxu2  ;;  %v279_v23 = vpop.f32.mrf.mxu3 }
  0xa8   : > { %v274_v24 = vadd.f32 %v497_v9, %v273_v22  ;;  %v280_v25 = vadd.f32 %v497_v9, %v279_v23 }
  0xaa   : > { %288 = vst.msk [vmem:[%s191_s6 + $0x28] sm:$0xff] %vm282_vm1, %v274_v24 }
  0xab   : > { %290 = vst.msk [vmem:[%s191_s6 + $0x38] sm:$0xff] %vm282_vm1, %v280_v25 }
  0xac   : > { %525 = shalt.err (!%p522_p7)
}
  0xad   : > { %s594_s24 = smov 128   ;;  %s595_s6 = smov 256  }
  0xae   : > { %s596_s7 = smov 8  }
  0xaf   : > { %423 = dma.vmem_to_hbm [thread:$0]  (%p668_p3), %s721_s15, 1024, %s309_s10, %s292_s11, %s594_s24, %s595_s6, %s596_s7  }
  0xb0 PF: > { %p429_p9 = scmp.ge.s32.totalorder %s592_s19, 2  ;;  %s323_s8 = sand.u32 1, %s564_s12  }
  0xb1   : > { %s324_s16 = scalar_lea.sflag [#allocation3], %s323_s8 }
  0xb2   : > { %p426_p10 = pnand %p429_p9, %p677_p8 }
  0xb4   : > { %p427_p11 = pneg %p426_p10 }
  0xb6   : > { %559 = dma.done.wait (%p427_p11), %s324_s16, 1024  }
  0xb7   : > { %561 = vsyncadd (%p427_p11), %s324_s16, 4294966272  ;;  %s16_s19 = sadd.s32 1, %s592_s19   ;;  %s773_s12 = smov %s568_s13 }
  0xb8   : > { %p13_p12 = scmp.ge.s32.totalorder %s16_s19, 6   ;;  %s774_s13 = smov %s572_s14 }
  0xb9   : > { %s775_s14 = smov %s686_s30  ;;  %s776_s15 = smov %s584_s17 }
  0xba   : > { %s777_s16 = smov %s588_s18  ;;  %s778_s17 = smov %s781_s22 }
  0xbb   : > { %s779_s18 = smov %s785_s23  ;;  %15 = sbr.rel (!%p13_p12) target bundleno = 5 (0x5), region = 70 }
  0xc0   :  { %330 = vsyncpa [#allocation3], 1 }
  0xc1   :  { %332 = vsyncpa [#allocation3 + $0x1], 1 }

</bundles_post_ra>
